<compile_context>
chip_gen: v5e
topology: v5e:2x2
jax: 0.10.0
libtpu: 0.0.40
codegen_flags: <defaults>
</compile_context>

<pallas_src>
import math

import jax
import jax.numpy as jnp
from jax.experimental import pallas as pl
from jax.experimental.pallas import tpu as pltpu


# --------------------------------------------------------------------------------------
# Activation
# --------------------------------------------------------------------------------------
def _gelu_exact(x):
    # PyTorch nn.GELU() default = exact erf-based GELU.
    return 0.5 * x * (1.0 + jax.lax.erf(x * (1.0 / math.sqrt(2.0))))


def _gelu_tanh(x):
    # Tanh approximation: lowers onto the EUP slot (otherwise idle), relieving the VALU.
    return jax.nn.gelu(x, approximate=True)


# --------------------------------------------------------------------------------------
# Kernel
# --------------------------------------------------------------------------------------
def _make_kernel(tg, tc, h, nk, approximate_gelu):
    rows = tg * tc
    act_fn = _gelu_tanh if approximate_gelu else _gelu_exact

    def kernel(x_ref, w1_ref, b1_ref, w2_ref, b2_ref, o_ref, *scratch):
        # Block views at grid point (expert, group-block, token-block[, pff-block]):
        #   x_ref:  (tg, 1, tc, h)    w1_ref: (h, tk)   b1_ref: (1, tk)
        #   o_ref:  (tg, 1, tc, h)    w2_ref: (tk, h)   b2_ref: (1, h)
        x = x_ref[...].reshape(rows, h)          # merge (group, token) rows for the MXU LHS

        # Matmul 1 (+ bias, GELU): native-dtype MXU feed, f32 accumulation.
        h1 = jnp.dot(x, w1_ref[...], preferred_element_type=jnp.float32)
        h1 = h1 + b1_ref[...].astype(jnp.float32)        # (rows, tk)
        act = act_fn(h1)
        # TODO(synk): dropout omitted (drop_rate=0 / eval mode -> identity).

        # Matmul 2 (partial over this p_ff tile).
        part = jnp.dot(act.astype(w2_ref.dtype), w2_ref[...],
                       preferred_element_type=jnp.float32)   # (rows, h) f32

        if nk == 1:
            # Weight-resident / fused path: no accumulator scratch, no zero-fill.
            out = part + b2_ref[...].astype(jnp.float32)
            o_ref[...] = out.reshape(o_ref.shape).astype(o_ref.dtype)
        else:
            acc_ref = scratch[0]
            ki = pl.program_id(3)

            @pl.when(ki == 0)
            def _first():
                # Direct store (no zero-init) with b2 folded in -> no finalize add.
                acc_ref[...] = part + b2_ref[...].astype(jnp.float32)

            @pl.when(ki != 0)
            def _accumulate():
                acc_ref[...] += part

            @pl.when(ki == nk - 1)
            def _store():
                o_ref[...] = acc_ref[...].reshape(o_ref.shape).astype(o_ref.dtype)

    return kernel


# --------------------------------------------------------------------------------------
# VMEM budget / tile planning
# --------------------------------------------------------------------------------------
def _vmem_budget_bytes():
    """~80% of this generation's VMEM capacity (102 MiB on v5e/v6e, ~51 MiB on v7x)."""
    cap = None
    try:
        cap = int(pltpu.get_tpu_info().vmem_capacity_bytes)
    except Exception:
        cap = None
    if not cap or cap <= 0:
        cap = 64 * 1024 * 1024   # conservative fallback (v7x per-TC physical VMEM)
    return int(cap * 0.8)


def _vmem_estimate(rows, tk, h, x_bytes, w_bytes, out_bytes, nk):
    """Conservative per-step VMEM footprint (double-buffered blocks + f32 temps/acc)."""
    est = 2 * rows * h * x_bytes                 # x blocks (double-buffered)
    est += 2 * rows * h * out_bytes              # out blocks
    est += 2 * (h * tk + tk) * w_bytes           # w1 + b1 blocks
    est += 2 * (tk * h + h) * w_bytes            # w2 + b2 blocks
    est += 0 if nk == 1 else rows * h * 4        # f32 accumulator scratch
    est += 2 * rows * tk * 4 + 2 * rows * h * 4  # f32 intermediates (h1/act, partial)
    est += 1 << 20                               # headroom for Mosaic internal scratch
    return est


def _row_tile_candidates(g, c):
    """Candidate (tg, tc) token-row tilings, biggest MXU-friendly row count first."""
    cands = []
    for target in (1024, 512, 256, 128, 64, 32, 16, 8):
        if c % 8 == 0 and c < target and g > 1:
            tg = 1
            for d in range(g, 0, -1):
                if g % d == 0 and d * c <= target:
                    tg = d
                    break
            cands.append((tg, c))
        else:
            for d in range(min(c, target), 0, -1):
                if c % d == 0 and (d % 8 == 0 or d == c):
                    cands.append((1, d))
                    break
    if not cands:
        cands.append((1, c))
    seen, out = set(), []
    for rc in cands:
        if rc not in seen:
            seen.add(rc)
            out.append(rc)
    return out


def _k_tile_candidates(p_ff):
    """tk candidates: full p_ff (weight residency) first, then 256-aligned, then
    128-aligned divisors, descending."""
    cands = [p_ff]
    for align in (256, 128):
        for d in range(p_ff, 0, -1):
            if p_ff % d == 0 and d % align == 0:
                cands.append(d)
    seen, out = set(), []
    for d in cands:
        if d not in seen:
            seen.add(d)
            out.append(d)
    return out


def _plan_tiles(g, c, h, p_ff, x_bytes, w_bytes, out_bytes, budget):
    rows_cands = _row_tile_candidates(g, c)
    tk_cands = _k_tile_candidates(p_ff)

    # Priority 1: weight-resident shard (tk = p_ff -> nk = 1): per-expert weights are
    # streamed from HBM once and reused across every (group, token-tile) grid step.
    for tg, tc in rows_cands:
        if _vmem_estimate(tg * tc, p_ff, h, x_bytes, w_bytes, out_bytes, 1) <= budget:
            return tg, tc, p_ff

    # Priority 2: largest aligned p_ff tile, then the biggest row tile that fits.
    for tk in tk_cands[1:]:
        nk = p_ff // tk
        for tg, tc in rows_cands:
            if _vmem_estimate(tg * tc, tk, h, x_bytes, w_bytes, out_bytes, nk) <= budget:
                return tg, tc, tk

    # Fallback: smallest candidates (may exceed the soft budget; still correct).
    tg, tc = rows_cands[-1]
    return tg, tc, tk_cands[-1]


# --------------------------------------------------------------------------------------
# Wrapper
# --------------------------------------------------------------------------------------
def tp_experts_forward(inputs, w1, b1, w2, b2, *, tg=None, tc=None, tk=None,
                       approximate_gelu=False, vmem_budget_bytes=None):
    """inputs: (g, e, c, h). Returns the same shape (TPExperts.forward semantics)."""
    g, e, c, h = inputs.shape
    assert w1.shape[0] == e and w1.shape[1] == h
    p_ff = w1.shape[-1]

    x_bytes = jnp.dtype(inputs.dtype).itemsize
    w_bytes = jnp.dtype(w1.dtype).itemsize
    out_bytes = x_bytes

    budget = _vmem_budget_bytes() if vmem_budget_bytes is None else int(vmem_budget_bytes)

    a_tg, a_tc, a_tk = _plan_tiles(g, c, h, p_ff, x_bytes, w_bytes, out_bytes, budget)
    tg = a_tg if tg is None else tg
    tc = a_tc if tc is None else tc
    tk = a_tk if tk is None else tk
    assert g % tg == 0 and c % tc == 0 and p_ff % tk == 0

    rows = tg * tc
    nk = p_ff // tk
    gb, cb = g // tg, c // tc

    est = _vmem_estimate(rows, tk, h, x_bytes, w_bytes, out_bytes, nk)
    vmem_limit = int(min(budget, max(32 * 1024 * 1024, 2 * est)))

    # Expert axis outermost so per-core iteration is expert-major -> weight blocks stay
    # resident across all token tiles of an expert; p_ff reduction innermost ("arbitrary").
    if nk == 1:
        grid = (e, gb, cb)
        dims = ("parallel", "parallel", "parallel")
        x_map = lambda ei, gi, ci: (gi, ei, ci, 0)
        w1_map = lambda ei, gi, ci: (ei, 0, 0)
        b1_map = lambda ei, gi, ci: (ei, 0, 0)
        w2_map = lambda ei, gi, ci: (ei, 0, 0)
        b2_map = lambda ei, gi, ci: (ei, 0, 0)
        scratch = []
    else:
        grid = (e, gb, cb, nk)
        dims = ("parallel", "parallel", "parallel", "arbitrary")
        x_map = lambda ei, gi, ci, ki: (gi, ei, ci, 0)
        w1_map = lambda ei, gi, ci, ki: (ei, 0, ki)
        b1_map = lambda ei, gi, ci, ki: (ei, 0, ki)
        w2_map = lambda ei, gi, ci, ki: (ei, ki, 0)
        b2_map = lambda ei, gi, ci, ki: (ei, 0, 0)
        scratch = [pltpu.VMEM((rows, h), jnp.float32)]
    o_map = x_map

    cost = pl.CostEstimate(
        flops=4 * g * e * c * h * p_ff,
        transcendentals=g * e * c * p_ff,
        bytes_accessed=(g * e * c * h * (x_bytes + out_bytes)
                        + e * (h * p_ff + p_ff + p_ff * h + h) * w_bytes),
    )

    kernel = _make_kernel(tg, tc, h, nk, approximate_gelu)

    return pl.pallas_call(
        kernel,
        out_shape=jax.ShapeDtypeStruct((g, e, c, h), inputs.dtype),
        grid_spec=pltpu.PrefetchScalarGridSpec(
            num_scalar_prefetch=0,
            grid=grid,
            in_specs=[
                # x is read directly in (g, e, c, h) layout -- no wrapper transpose/copy.
                pl.BlockSpec((tg, 1, tc, h), x_map),
                # Weight / bias blocks: index depends only on (expert[, pff tile]) -> they
                # are NOT re-DMA'd across group / token-tile grid steps.
                pl.BlockSpec((pl.Squeezed(), h, tk), w1_map),
                pl.BlockSpec((pl.Squeezed(), 1, tk), b1_map),
                pl.BlockSpec((pl.Squeezed(), tk, h), w2_map),
                pl.BlockSpec((pl.Squeezed(), 1, h), b2_map),
            ],
            out_specs=pl.BlockSpec((tg, 1, tc, h), o_map),
            scratch_shapes=scratch,
        ),
        compiler_params=pltpu.CompilerParams(
            dimension_semantics=dims,
            vmem_limit_bytes=vmem_limit,
        ),
        cost_estimate=cost,
    )(inputs, w1, b1, w2, b2)


# --------------------------------------------------------------------------------------
# Parameter init (matches the torch module's trunc_normal_ init)
# --------------------------------------------------------------------------------------
def init_tp_experts_params(key, num_experts, d_model, d_ff, max_ep_size):
    assert d_ff % max_ep_size == 0
    p_ff = d_ff // max_ep_size
    s1 = math.sqrt(0.1 / d_model)
    s2 = math.sqrt(0.1 / d_ff)
    k1, k2, k3, k4 = jax.random.split(key, 4)
    tn = lambda k, shape, std: std * jax.random.truncated_normal(
        k, -2.0, 2.0, shape, dtype=jnp.float32)
    w1 = tn(k1, (num_experts, d_model, p_ff), s1)
    b1 = tn(k2, (num_experts, 1, p_ff), s1)
    w2 = tn(k3, (num_experts, p_ff, d_model), s2)
    b2 = tn(k4, (num_experts, 1, d_model), s2)
    return w1, b1, w2, b2


def _reference(inputs, w1, b1, w2, b2):
    g, e, c, h = inputs.shape
    xe = jnp.transpose(inputs, (1, 0, 2, 3)).reshape(e, -1, h)
    ff = jnp.einsum("eth,ehp->etp", xe, w1) + b1
    out = jnp.einsum("etp,eph->eth", _gelu_exact(ff), w2) + b2
    return jnp.transpose(out.reshape(e, g, c, h), (1, 0, 2, 3))


if __name__ == "__main__":
    key = jax.random.PRNGKey(0)

    # Small, module-consistent shapes.
    num_experts = 2        # 'all_gather' comm -> experts == MOE_CONTEXT.max_ep_size
    d_model = 128
    d_ff = 512
    max_ep_size = 2        # tensor-parallel shard: p_ff = d_ff // max_ep_size = 256
    g, c = 2, 16           # groups x capacity -> 32 tokens per expert

    kp, kx = jax.random.split(key)
    w1, b1, w2, b2 = init_tp_experts_params(kp, num_experts, d_model, d_ff, max_ep_size)
    x = jax.random.normal(kx, (g, num_experts, c, d_model), dtype=jnp.float32)

    ref = _reference(x, w1, b1, w2, b2)

    # 1) Auto plan: weight-resident (tk = p_ff, nk = 1) + group-merged MXU rows.
    out0 = tp_experts_forward(x, w1, b1, w2, b2)
    jax.block_until_ready(out0)
    assert out0.shape == x.shape
    assert jnp.allclose(out0, ref, atol=1e-4, rtol=1e-4), "mismatch vs reference (auto plan)"

    # 2) Forced small tiles: exercises the p_ff reduction/accumulation path (nk > 1).
    out1 = tp_experts_forward(x, w1, b1, w2, b2, tg=1, tc=8, tk=128)
    jax.block_until_ready(out1)
    assert jnp.allclose(out1, ref, atol=1e-4, rtol=1e-4), "mismatch vs reference (nk>1)"

    # 3) Group-merged rows together with the reduction path.
    out2 = tp_experts_forward(x, w1, b1, w2, b2, tg=2, tc=16, tk=128)
    jax.block_until_ready(out2)
    assert jnp.allclose(out2, ref, atol=1e-4, rtol=1e-4), "mismatch vs reference (tg>1, nk>1)"

    print("KERNEL_OK")
</pallas_src>

<mosaic_0001>
module attributes {stable_mosaic.version = 11 : i64} {
  func.func @kernel(%arg0: i32, %arg1: i32, %arg2: i32, %arg3: memref<2x1x16x128xf32, #tpu.memory_space<vmem>>, %arg4: memref<1x128x256xf32, #tpu.memory_space<vmem>>, %arg5: memref<1x1x256xf32, #tpu.memory_space<vmem>>, %arg6: memref<1x256x128xf32, #tpu.memory_space<vmem>>, %arg7: memref<1x1x128xf32, #tpu.memory_space<vmem>>, %arg8: memref<2x1x16x128xf32, #tpu.memory_space<vmem>>) attributes {dimension_semantics = [#tpu.dimension_semantics<parallel>, #tpu.dimension_semantics<parallel>, #tpu.dimension_semantics<parallel>], iteration_bounds = array<i64: 2, 1, 1>, scalar_prefetch = 0 : i64, scratch_operands = 0 : i64, tpu.core_type = #tpu.core_type<tc>, window_params = [{transform_indices = @transform_0, window_bounds = array<i64: 2, 1, 16, 128>}, {transform_indices = @transform_1, window_bounds = array<i64: 1, 128, 256>}, {transform_indices = @transform_2, window_bounds = array<i64: 1, 1, 256>}, {transform_indices = @transform_3, window_bounds = array<i64: 1, 256, 128>}, {transform_indices = @transform_4, window_bounds = array<i64: 1, 1, 128>}, {transform_indices = @transform_5, window_bounds = array<i64: 2, 1, 16, 128>}]} {
    %c0 = arith.constant 0 : index
    %c0_0 = arith.constant 0 : index
    %c0_1 = arith.constant 0 : index
    %c0_2 = arith.constant 0 : index
    %0 = vector.load %arg3[%c0, %c0_0, %c0_1, %c0_2] : memref<2x1x16x128xf32, #tpu.memory_space<vmem>>, vector<2x1x16x128xf32>
    %1 = vector.shape_cast %0 : vector<2x1x16x128xf32> to vector<32x128xf32>
    %c0_3 = arith.constant 0 : index
    %c0_4 = arith.constant 0 : index
    %c0_5 = arith.constant 0 : index
    %2 = vector.load %arg4[%c0_3, %c0_4, %c0_5] : memref<1x128x256xf32, #tpu.memory_space<vmem>>, vector<1x128x256xf32>
    %3 = vector.shape_cast %2 : vector<1x128x256xf32> to vector<128x256xf32>
    %cst = arith.constant dense<0.000000e+00> : vector<32x256xf32>
    %4 = tpu.matmul %1, %3, %cst {dimension_numbers = #tpu.dot_dimension_numbers<[1], [0], [0], [1], [0, 0, 1, 1], [], []>} : vector<32x128xf32>, vector<128x256xf32>, vector<32x256xf32> -> vector<32x256xf32>
    %c0_6 = arith.constant 0 : index
    %c0_7 = arith.constant 0 : index
    %c0_8 = arith.constant 0 : index
    %5 = vector.load %arg5[%c0_6, %c0_7, %c0_8] : memref<1x1x256xf32, #tpu.memory_space<vmem>>, vector<1x1x256xf32>
    %6 = vector.shape_cast %5 : vector<1x1x256xf32> to vector<1x256xf32>
    %7 = vector.broadcast %6 : vector<1x256xf32> to vector<32x256xf32>
    %8 = arith.addf %4, %7 : vector<32x256xf32>
    %cst_9 = arith.constant 5.000000e-01 : f32
    %9 = vector.broadcast %cst_9 : f32 to vector<32x256xf32>
    %10 = arith.mulf %9, %8 : vector<32x256xf32>
    %cst_10 = arith.constant 0.707106769 : f32
    %11 = vector.broadcast %cst_10 : f32 to vector<32x256xf32>
    %12 = arith.mulf %8, %11 : vector<32x256xf32>
    %13 = math.erf %12 : vector<32x256xf32>
    %cst_11 = arith.constant 1.000000e+00 : f32
    %14 = vector.broadcast %cst_11 : f32 to vector<32x256xf32>
    %15 = arith.addf %14, %13 : vector<32x256xf32>
    %16 = arith.mulf %10, %15 : vector<32x256xf32>
    %c0_12 = arith.constant 0 : index
    %c0_13 = arith.constant 0 : index
    %c0_14 = arith.constant 0 : index
    %17 = vector.load %arg6[%c0_12, %c0_13, %c0_14] : memref<1x256x128xf32, #tpu.memory_space<vmem>>, vector<1x256x128xf32>
    %18 = vector.shape_cast %17 : vector<1x256x128xf32> to vector<256x128xf32>
    %cst_15 = arith.constant dense<0.000000e+00> : vector<32x128xf32>
    %19 = tpu.matmul %16, %18, %cst_15 {dimension_numbers = #tpu.dot_dimension_numbers<[1], [0], [0], [1], [0, 0, 1, 1], [], []>} : vector<32x256xf32>, vector<256x128xf32>, vector<32x128xf32> -> vector<32x128xf32>
    %c0_16 = arith.constant 0 : index
    %c0_17 = arith.constant 0 : index
    %c0_18 = arith.constant 0 : index
    %20 = vector.load %arg7[%c0_16, %c0_17, %c0_18] : memref<1x1x128xf32, #tpu.memory_space<vmem>>, vector<1x1x128xf32>
    %21 = vector.shape_cast %20 : vector<1x1x128xf32> to vector<1x128xf32>
    %22 = vector.broadcast %21 : vector<1x128xf32> to vector<32x128xf32>
    %23 = arith.addf %19, %22 : vector<32x128xf32>
    %24 = vector.shape_cast %23 : vector<32x128xf32> to vector<2x1x16x128xf32>
    %c0_19 = arith.constant 0 : index
    %c0_20 = arith.constant 0 : index
    %c0_21 = arith.constant 0 : index
    %c0_22 = arith.constant 0 : index
    %25 = vector.load %arg8[%c0_19, %c0_20, %c0_21, %c0_22] : memref<2x1x16x128xf32, #tpu.memory_space<vmem>>, vector<2x1x16x128xf32>
    tpu.vector_store %arg8[%c0_19, %c0_20, %c0_21, %c0_22], %24 {strides = array<i32>} : memref<2x1x16x128xf32, #tpu.memory_space<vmem>>, vector<2x1x16x128xf32>,
    return
  }
  func.func @transform_0(%arg0: i32, %arg1: i32, %arg2: i32) -> (i32, i32, i32, i32) {
    %c0_i32 = arith.constant 0 : i32
    %c0_i32_0 = arith.constant 0 : i32
    return %arg1, %arg0, %arg2, %c0_i32 : i32, i32, i32, i32
  }
  func.func @transform_1(%arg0: i32, %arg1: i32, %arg2: i32) -> (i32, i32, i32) {
    %c0_i32 = arith.constant 0 : i32
    %c0_i32_0 = arith.constant 0 : i32
    %c0_i32_1 = arith.constant 0 : i32
    return %arg0, %c0_i32, %c0_i32_0 : i32, i32, i32
  }
  func.func @transform_2(%arg0: i32, %arg1: i32, %arg2: i32) -> (i32, i32, i32) {
    %c0_i32 = arith.constant 0 : i32
    %c0_i32_0 = arith.constant 0 : i32
    %c0_i32_1 = arith.constant 0 : i32
    return %arg0, %c0_i32, %c0_i32_0 : i32, i32, i32
  }
  func.func @transform_3(%arg0: i32, %arg1: i32, %arg2: i32) -> (i32, i32, i32) {
    %c0_i32 = arith.constant 0 : i32
    %c0_i32_0 = arith.constant 0 : i32
    %c0_i32_1 = arith.constant 0 : i32
    return %arg0, %c0_i32, %c0_i32_0 : i32, i32, i32
  }
  func.func @transform_4(%arg0: i32, %arg1: i32, %arg2: i32) -> (i32, i32, i32) {
    %c0_i32 = arith.constant 0 : i32
    %c0_i32_0 = arith.constant 0 : i32
    %c0_i32_1 = arith.constant 0 : i32
    return %arg0, %c0_i32, %c0_i32_0 : i32, i32, i32
  }
  func.func @transform_5(%arg0: i32, %arg1: i32, %arg2: i32) -> (i32, i32, i32, i32) {
    %c0_i32 = arith.constant 0 : i32
    %c0_i32_0 = arith.constant 0 : i32
    return %arg1, %arg0, %arg2, %c0_i32 : i32, i32, i32, i32
  }
}

</mosaic_0001>

<bundles_post_ra>
// kernel: tpu_custom_call.1
= control target key start
LH: loop header
LB: loop body
LE: loop exit
PB: predicated region body
PF: predicated region fallthrough
CT: control target
= control target key end

     0   :  { %s2110_s0 = inlined_call_operand.hbm [shape: f32[2,2,16,128], index: 0, kind: input, shape index: {}]   ;;  %s2111_s1 = inlined_call_operand.hbm [shape: f32[2,128,256], index: 1, kind: input, shape index: {}]   ;;  %s2112_s2 = inlined_call_operand.hbm [shape: f32[2,1,256], index: 2, kind: input, shape index: {}]   ;;  %s2113_s3 = inlined_call_operand.hbm [shape: f32[2,256,128], index: 3, kind: input, shape index: {}]   ;;  %s2114_s4 = inlined_call_operand.vmem [shape: f32[2,1,128], index: 4, kind: input, shape index: {}]   ;;  %s2115_s5 = inlined_call_operand.hbm [shape: f32[2,2,16,128], index: 5, kind: output, shape index: {}]  }
   0x1   :  { %2120 = sst [smem:[#allocation25_spill]] %s2110_s0 }
   0x2   :  { %2121 = sst [smem:[#allocation26_spill]] %s2111_s1 }
   0x3   :  { %10 = vsyncpa [#allocation3], 0 }
   0x4   :  { %12 = vsyncpa [#allocation3 + $0x1], 0 }
   0x5   :  { %13 = vsyncpa [#allocation6], 0 }
   0x6   :  { %15 = vsyncpa [#allocation6 + $0x1], 0 }
   0x7   :  { %16 = vsyncpa [#allocation9], 0 }
   0x8   :  { %18 = vsyncpa [#allocation9 + $0x1], 0 }
   0x9   :  { %19 = vsyncpa [#allocation4], 0 }
   0xa   :  { %21 = vsyncpa [#allocation4 + $0x1], 0  ;;  %s1548_s18 = smov 0   ;;  %s1550_s19 = smov 0  }
   0xb   :  { %s1552_s20 = smov 0   ;;  %s1554_s21 = smov 0  }
   0xc   :  { %s1556_s22 = smov 0   ;;  %s1558_s23 = smov 0  }
   0xd LB: > { %2122 = sst [smem:[#allocation20_spill]] %s1479_s18  ;;  %s1579_s24 = sadd.s32 4294967295, %s1499_s23   ;;  %s1499_s23 = sphi %s1558_s23, %s27_s23   ;;  %s1495_s22 = sphi %s1556_s22, %s2147_s22   ;;  %s1491_s21 = sphi %s1554_s21, %s2146_s21   ;;  %s1487_s20 = sphi %s1552_s20, %s2142_s20   ;;  %s1483_s19 = sphi %s1550_s19, %s2145_s19   ;;  %s1479_s18 = sphi %s1548_s18, %s2144_s18  }
   0xe   : > { %2123 = sst [smem:[#allocation21_spill]] %s1487_s20  ;;  %s1204_s25 = sadd.s32 4294967294, %s1499_s23  }
   0xf   : > { %s46_s26 = sadd.s32 1, %s1495_s22  ;;  %s57_s27 = sadd.s32 1, %s1487_s20 }
  0x10   : > { %p48_p0 = scmp.ge.s32.totalorder %s46_s26, 2  ;;  %p64_p1 = scmp.ne.s32.totalorder %s1487_s20, %s1483_s19 }
  0x11   : > { %p65_p2 = scmp.eq.s32.totalorder %s1499_s23, 0  ;;  %p70_p3 = scmp.ne.s32.totalorder %s1483_s19, %s1479_s18 }
  0x12   : > { %s2149_s26 = smov (%p48_p0, %s46_s26), 0  ;;  %p71_p5 = scmp.eq.s32.totalorder %s1579_s24, 0 }
  0x13   : > { %2124 = sst [smem:[#allocation22_spill]] %s2149_s26  ;;  %p1591_p4 = por %p65_p2, %p64_p1 }
  0x14   : > { %s51_s29 = ssub.s32 %s1495_s22, %s2149_s26  ;;  %p202_p6 = scmp.eq.s32.totalorder %s1579_s24, 1 }
  0x15   : > { %p55_p7 = scmp.eq.s32.totalorder %s51_s29, 0  ;;  %p1599_p8 = por %p71_p5, %p70_p3 }
  0x16   : > { %p1603_p9 = por %p202_p6, %p64_p1  ;;  %p208_p10 = scmp.eq.s32.totalorder %s1204_s25, 1 }
  0x17   : > { %s1608_s7 = scalar_select %p55_p7, %s1487_s20, %s57_s27  }
  0x18   : > { %p1610_p11 = por %p208_p10, %p70_p3  ;;  %p1206_p12 = scmp.ge.s32.totalorder %s1499_s23, 2 }
  0x19   : > { %2128 = sst [smem:[#allocation23_spill]] %s1608_s7 }
  0x1a   : > { %s2129_s8 = scalar_select %p1610_p11, 1, 0 }
  0x1b   : > { %224 = sbr.rel (%p1206_p12) target bundleno = 61 (0x3d), region = 16 }
  0x1c   : > { %2130 = sst [smem:[#allocation24_spill]] %s2129_s8 }
  0x20   : > { %s1618_s9 = sand.u32 1, %s1487_s20   ;;  %s1239_s10 = sshll.u32 %s1495_s22, 4 }
  0x21   : > { %s1207_s11 = sshll.u32 %s1618_s9, 5  ;;  %s2131_s0 = sld [smem:[#allocation25_spill]] }
  0x22   : > { %s1243_s15 = scalar_select %p1591_p4, [#allocation0], [#allocation15] }
  0x23   : > { %s232_s17 = scalar_lea.vmem [#allocation2], %s1207_s11  ;;  %s1501_s29 = smov 512  }
  0x24   : > { %s257_s25 = sshll.u32 %s232_s17, 4  ;;  %s247_s27 = sld [smem:[%s1243_s15]]   ;;  %s258_s25 = int_to_ptr.vmem [resolvable:$true] %s257_s25 }
  0x25   : > { %1244 = sst [smem:[#allocation12]] (%p1591_p4), %s1501_s29  ;;  %s1502_s26 = smov 256  }
  0x26   : > { %1245 = sst [smem:[#allocation12 + $0x1]] (%p1591_p4), %s1502_s26  ;;  %s1503_s12 = smov 2  }
  0x27   : > { %s242_s14 = scalar_lea.hbm %s2131_s0, %s1239_s10  ;;  %1246 = sst [smem:[#allocation12 + $0x2]] (%p1591_p4), %s1503_s12 }
  0x28   : > { %s255_s16 = sshll.u32 %s242_s14, 4  ;;  %s1504_s10 = smov 128   ;;  %s256_s16 = int_to_ptr.hbm [resolvable:$true] %s255_s16 }
  0x29   : > { %1247 = sst [smem:[#allocation12 + $0x3]] (%p1591_p4), %s1504_s10  ;;  %s1505_s14 = smov 8  }
  0x2a   : > { %s1210_s11 = sshll.u32 %s247_s27, 26  ;;  %1248 = sst [smem:[#allocation12 + $0x4]] (%p1591_p4), %s1504_s10 }
  0x2b   : > { %s1211_s13 = sadd.s32 134217728, %s1210_s11  ;;  %1249 = sst [smem:[#allocation12 + $0x5]] (%p1591_p4), %s1505_s14 }
  0x2c   : > { %s229_s15 = scalar_lea.sflag [#allocation3], %s1618_s9  ;;  %s1506_s17 = smov [#allocation11]  }
  0x2d   : > { %1250 = dma.general (%p1591_p4), %s256_s16, 512, %s258_s25, %s229_s15, %s1506_s17, [#allocation12], %s1211_s13, 0  }
  0x2e   : > { %s280_s26 = sand.u32 1, %s1499_s23   ;;  %s1212_s29 = sshll.u32 %s1618_s9, 8 }
  0x2f   : > { %s1240_s12 = sshll.u32 %s1495_s22, 8  ;;  %s284_s27 = scalar_lea.vmem [#allocation5], %s1212_s29 }
  0x30   : > { %s292_s0 = sshll.u32 %s284_s27, 4  ;;  %s2132_s1 = sld [smem:[#allocation26_spill]]  ;;  %s293_s0 = int_to_ptr.vmem [resolvable:$true] %s292_s0 }
  0x31   : > { %s281_s16 = scalar_lea.sflag [#allocation6], %s280_s26  ;;  %s1507_s25 = smov 256  }
  0x32   : > { %s1508_s13 = smov 16   ;;  %s1215_s15 = sshll.u32 %s1618_s9, 1 }
  0x33   : > { %s1216_s17 = sshll.u32 %s1495_s22, 1  ;;  %s306_s10 = scalar_lea.vmem [#allocation7], %s1215_s15 }
  0x34   : > { %s310_s27 = scalar_lea.hbm %s2112_s2, %s1216_s17  ;;  %s314_s11 = sshll.u32 %s306_s10, 4  ;;  %s315_s11 = int_to_ptr.vmem [resolvable:$true] %s314_s11 }
  0x35   : > { %s312_s18 = sshll.u32 %s310_s27, 4  ;;  %s1509_s20 = smov 128   ;;  %s313_s18 = int_to_ptr.hbm [resolvable:$true] %s312_s18 }
  0x36   : > { %s289_s7 = scalar_lea.hbm %s2132_s1, %s1240_s12  ;;  %s330_s1 = scalar_lea.hbm %s2113_s3, %s1240_s12 }
  0x37   : > { %s290_s14 = sshll.u32 %s289_s7, 4  ;;  %s1510_s8 = smov 8   ;;  %s291_s14 = int_to_ptr.hbm [resolvable:$true] %s290_s14 }
  0x38   : > { %1251 = dma.hbm_to_vmem [thread:$0]  (%p1591_p4), %s291_s14, 4096, %s293_s0, %s281_s16, %s1507_s25, %s1507_s25, %s1508_s13  }
  0x39   : > { %1252 = dma.hbm_to_vmem [thread:$0]  (%p1591_p4), %s313_s18, 32, %s315_s11, %s281_s16  }
  0x3a   : > { %s325_s0 = scalar_lea.vmem [#allocation8], %s1212_s29  ;;  %s331_s25 = sshll.u32 %s330_s1, 4  ;;  %s332_s25 = int_to_ptr.hbm [resolvable:$true] %s331_s25 }
  0x3b   : > { %s333_s14 = sshll.u32 %s325_s0, 4  ;;  %s322_s13 = scalar_lea.sflag [#allocation9], %s1618_s9  ;;  %s334_s14 = int_to_ptr.vmem [resolvable:$true] %s333_s14 }
  0x3c   : > { %1253 = dma.hbm_to_vmem [thread:$0]  (%p1591_p4), %s332_s25, 4096, %s334_s14, %s322_s13, %s1509_s20, %s1509_s20, %s1510_s8  }
  0x3d PF: > { %p1220_p13 = scmp.ge.s32.totalorder %s1499_s23, 1  ;;  %p347_p0 = scmp.lt.s32.totalorder %s1499_s23, 3 }
  0x3f   : > { %p348_p1 = pnand %p1220_p13, %p347_p0 }
  0x40   : > { %s1666_s18 = sand.u32 (!%p348_p1), 1, %s1483_s19  }
  0x41   : > { %351 = sbr.rel (%p348_p1) target bundleno = 487 (0x1e7), region = 40  ;;  %s1221_s1 = sshll.u32 (!%p348_p1), %s1666_s18, 5 }
  0x42   : > { %s354_s9 = scalar_lea.sflag (!%p348_p1), [#allocation3], %s1666_s18  ;;  %s1672_s29 = scalar_lea.vmem (!%p348_p1), [#allocation2], %s1221_s1 }
  0x46   : > { %1462 = dma.done.wait (%p1599_p8), %s354_s9, 512  }
  0x47   : > { %1464 = vsyncadd (%p1599_p8), %s354_s9, 4294966784  ;;  %s363_s28 = sand.u32 1, %s1579_s24   ;;  %s1222_s12 = sshll.u32 %s1666_s18, 8 }
  0x48   : > { %s364_s16 = scalar_lea.sflag [#allocation6], %s363_s28  ;;  %s1680_s15 = scalar_lea.vmem [#allocation5], %s1222_s12 }
  0x49   : > { %1466 = dma.done.wait (%p1599_p8), %s364_s16, 4128  }
  0x4a   : > { %1468 = vsyncadd (%p1599_p8), %s364_s16, 4294963168  ;;  %s1223_s17 = sshll.u32 %s1666_s18, 1  ;;  %s384_s10 = scalar_lea.sflag [#allocation9], %s1666_s18 }
  0x4b   : > { %s1687_s27 = scalar_lea.vmem [#allocation7], %s1223_s17  ;;  %s1690_s11 = scalar_lea.vmem [#allocation8], %s1222_s12 }
  0x4c   : > { %1470 = dma.done.wait (%p1599_p8), %s384_s10, 4096  }
  0x4d   : > { %1472 = vsyncadd (%p1599_p8), %s384_s10, 4294963200  ;;  %v474_v0 = vld [vmem:[%s1680_s15 + $0xf0] sm:$0xff]  ;;  %v475_v1 = vld [vmem:[%s1680_s15 + $0xf8] sm:$0xff]  ;;  %p435_p2 = scmp.lt.s32.totalorder %s1491_s21, 1  ;;  %s432_s25 = scalar_lea.vmem [#allocation10], %s1221_s1 }
  0x4e   : > { %v472_v2 = vld [vmem:[%s1680_s15 + $0xe0] sm:$0xff]  ;;  %482 = vmatpush.msra.mxu0 %v474_v0  ;;  %511 = vmatpush.msra.mxu1 %v475_v1  ;;  %v473_v3 = vld [vmem:[%s1680_s15 + $0xe8] sm:$0xff]  ;;  %v470_v4 = vld [vmem:[%s1680_s15 + $0xd0] sm:$0xff]  ;;  %s991_s13 = scalar_lea.sflag [#allocation4], %s1666_s18 }
  0x4f   : > { %v471_v5 = vld [vmem:[%s1680_s15 + $0xd8] sm:$0xff]  ;;  %v468_v6 = vld [vmem:[%s1680_s15 + $0xc0] sm:$0xff]  ;;  %v469_v7 = vld [vmem:[%s1680_s15 + $0xc8] sm:$0xff]  ;;  %s1734_s24 = scalar_select %p435_p2, %s1491_s21, 1 }
  0x50   : > { %483 = vmatpush.msra.mxu0 %v472_v2  ;;  %512 = vmatpush.msra.mxu1 %v473_v3  ;;  %v466_v8 = vld [vmem:[%s1680_s15 + $0xb0] sm:$0xff]  ;;  %v467_v9 = vld [vmem:[%s1680_s15 + $0xb8] sm:$0xff]  ;;  %v464_v10 = vld [vmem:[%s1680_s15 + $0xa0] sm:$0xff] }
  0x51   : > { %v465_v11 = vld [vmem:[%s1680_s15 + $0xa8] sm:$0xff]  ;;  %v462_v12 = vld [vmem:[%s1680_s15 + $0x90] sm:$0xff]  ;;  %v463_v13 = vld [vmem:[%s1680_s15 + $0x98] sm:$0xff]  ;;  %s437_s26 = scalar_lea.vmem %s2114_s4, %s1734_s24 }
  0x52   : > { %484 = vmatpush.msra.mxu0 %v470_v4  ;;  %513 = vmatpush.msra.mxu1 %v471_v5  ;;  %v460_v14 = vld [vmem:[%s1680_s15 + $0x80] sm:$0xff]  ;;  %v461_v15 = vld [vmem:[%s1680_s15 + $0x88] sm:$0xff]  ;;  %v458_v16 = vld [vmem:[%s1680_s15 + $0x70] sm:$0xff] }
  0x53   : > { %v459_v17 = vld [vmem:[%s1680_s15 + $0x78] sm:$0xff]  ;;  %v456_v18 = vld [vmem:[%s1680_s15 + $0x60] sm:$0xff]  ;;  %v457_v19 = vld [vmem:[%s1680_s15 + $0x68] sm:$0xff] }
  0x54   : > { %485 = vmatpush.msra.mxu0 %v468_v6  ;;  %514 = vmatpush.msra.mxu1 %v469_v7  ;;  %v454_v20 = vld [vmem:[%s1680_s15 + $0x50] sm:$0xff]  ;;  %v455_v21 = vld [vmem:[%s1680_s15 + $0x58] sm:$0xff]  ;;  %v452_v22 = vld [vmem:[%s1680_s15 + $0x40] sm:$0xff] }
  0x55   : > { %v453_v23 = vld [vmem:[%s1680_s15 + $0x48] sm:$0xff]  ;;  %v450_v24 = vld [vmem:[%s1680_s15 + $0x30] sm:$0xff]  ;;  %v451_v25 = vld [vmem:[%s1680_s15 + $0x38] sm:$0xff] }
  0x56   : > { %486 = vmatpush.msra.mxu0 %v466_v8  ;;  %515 = vmatpush.msra.mxu1 %v467_v9  ;;  %v448_v26 = vld [vmem:[%s1680_s15 + $0x20] sm:$0xff]  ;;  %v449_v27 = vld [vmem:[%s1680_s15 + $0x28] sm:$0xff]  ;;  %v446_v28 = vld [vmem:[%s1680_s15 + $0x10] sm:$0xff] }
  0x57   : > { %v447_v29 = vld [vmem:[%s1680_s15 + $0x18] sm:$0xff]  ;;  %v444_v30 = vld [vmem:[%s1680_s15] sm:$0xff]  ;;  %v445_v31 = vld [vmem:[%s1680_s15 + $0x8] sm:$0xff] }
  0x58   : > { %487 = vmatpush.msra.mxu0 %v464_v10  ;;  %516 = vmatpush.msra.mxu1 %v465_v11  ;;  %v440_v32 = vld [vmem:[%s1672_s29] sm:$0xff]  ;;  %v441_v33 = vld [vmem:[%s1672_s29 + $0x8] sm:$0xff]  ;;  %v442_v34 = vld [vmem:[%s1672_s29 + $0x10] sm:$0xff] }
  0x59   : > { %v443_v35 = vld [vmem:[%s1672_s29 + $0x18] sm:$0xff]  ;;  %v476_v38 = vld [vmem:[%s1687_s27] sm:$0x3]  ;;  %v905_v43 = vld [vmem:[%s1690_s11 + $0x68] sm:$0xff] }
  0x5a   : > { %488 = vmatpush.msra.mxu0 %v462_v12  ;;  %517 = vmatpush.msra.mxu1 %v463_v13  ;;  %v907_v36 = vld [vmem:[%s1690_s11 + $0x78] sm:$0xff]  ;;  %v906_v39 = vld [vmem:[%s1690_s11 + $0x70] sm:$0xff]  ;;  %v1745_v41 = vperm.slane %v476_v38, 0  ;;  %v1747_v42 = vperm.slane %v476_v38, 1  ;;  %v921_v44 = vld [vmem:[%s1690_s11 + $0xe8] sm:$0xff] }
  0x5b   : > { %v923_v37 = vld [vmem:[%s1690_s11 + $0xf8] sm:$0xff]  ;;  %928 = vmatpush.msra.mxu2 %v907_v36  ;;  %v922_v40 = vld [vmem:[%s1690_s11 + $0xf0] sm:$0xff]  ;;  %v904_v47 = vld [vmem:[%s1690_s11 + $0x60] sm:$0xff] }
  0x5c   : > { %489 = vmatpush.msra.mxu0 %v460_v14  ;;  %518 = vmatpush.msra.mxu1 %v461_v15  ;;  %v920_v48 = vld [vmem:[%s1690_s11 + $0xe0] sm:$0xff]  ;;  %v903_v51 = vld [vmem:[%s1690_s11 + $0x58] sm:$0xff]  ;;  %v902_v55 = vld [vmem:[%s1690_s11 + $0x50] sm:$0xff] }
  0x5d   : > { %957 = vmatpush.msra.mxu3 %v923_v37  ;;  %929 = vmatpush.msra.mxu2 %v906_v39  ;;  %v919_v52 = vld [vmem:[%s1690_s11 + $0xd8] sm:$0xff]  ;;  %v918_v56 = vld [vmem:[%s1690_s11 + $0xd0] sm:$0xff]  ;;  %v901_v59 = vld [vmem:[%s1690_s11 + $0x48] sm:$0xff] }
  0x5e   : > { %490 = vmatpush.msra.mxu0 %v458_v16  ;;  %519 = vmatpush.msra.mxu1 %v459_v17  ;;  %v917_v60 = vld [vmem:[%s1690_s11 + $0xc8] sm:$0xff]  ;;  %v900_v1 = vld [vmem:[%s1690_s11 + $0x40] sm:$0xff]  ;;  %v899_v7 = vld [vmem:[%s1690_s11 + $0x38] sm:$0xff] }
  0x5f   : > { %958 = vmatpush.msra.mxu3 %v922_v40  ;;  %930 = vmatpush.msra.mxu2 %v905_v43  ;;  %v916_v2 = vld [vmem:[%s1690_s11 + $0xc0] sm:$0xff]  ;;  %v915_v8 = vld [vmem:[%s1690_s11 + $0xb8] sm:$0xff]  ;;  %v898_v15 = vld [vmem:[%s1690_s11 + $0x30] sm:$0xff] }
  0x60   : > { %491 = vmatpush.msra.mxu0 %v456_v18  ;;  %520 = vmatpush.msra.mxu1 %v457_v19  ;;  %v914_v16 = vld [vmem:[%s1690_s11 + $0xb0] sm:$0xff]  ;;  %v895_v37 = vld [vmem:[%s1690_s11 + $0x18] sm:$0xff] }
  0x61   : > { %959 = vmatpush.msra.mxu3 %v921_v44  ;;  %931 = vmatpush.msra.mxu2 %v904_v47  ;;  %v911_v38 = vld [vmem:[%s1690_s11 + $0x98] sm:$0xff]  ;;  %v894_v47 = vld [vmem:[%s1690_s11 + $0x10] sm:$0xff] }
  0x62   : > { %492 = vmatpush.msra.mxu0 %v454_v20  ;;  %521 = vmatpush.msra.mxu1 %v455_v21  ;;  %v897_v21 = vld [vmem:[%s1690_s11 + $0x28] sm:$0xff] }
  0x63   : > { %960 = vmatpush.msra.mxu3 %v920_v48  ;;  %932 = vmatpush.msra.mxu2 %v903_v51  ;;  %v910_v48 = vld [vmem:[%s1690_s11 + $0x90] sm:$0xff] }
  0x64   : > { %493 = vmatpush.msra.mxu0 %v452_v22  ;;  %522 = vmatpush.msra.mxu1 %v453_v23  ;;  %v913_v22 = vld [vmem:[%s1690_s11 + $0xa8] sm:$0xff] }
  0x65   : > { %961 = vmatpush.msra.mxu3 %v919_v52  ;;  %933 = vmatpush.msra.mxu2 %v902_v55 }
  0x66   : > { %494 = vmatpush.msra.mxu0 %v450_v24  ;;  %523 = vmatpush.msra.mxu1 %v451_v25 }
  0x67   : > { %962 = vmatpush.msra.mxu3 %v918_v56  ;;  %934 = vmatpush.msra.mxu2 %v901_v59 }
  0x68   : > { %495 = vmatpush.msra.mxu0 %v448_v26  ;;  %524 = vmatpush.msra.mxu1 %v449_v27 }
  0x69   : > { %963 = vmatpush.msra.mxu3 %v917_v60  ;;  %935 = vmatpush.msra.mxu2 %v900_v1 }
  0x6a   : > { %496 = vmatpush.msra.mxu0 %v446_v28  ;;  %525 = vmatpush.msra.mxu1 %v447_v29  ;;  %v896_v28 = vld [vmem:[%s1690_s11 + $0x20] sm:$0xff] }
  0x6b   : > { %964 = vmatpush.msra.mxu3 %v916_v2  ;;  %936 = vmatpush.msra.mxu2 %v899_v7  ;;  %v912_v29 = vld [vmem:[%s1690_s11 + $0xa0] sm:$0xff] }
  0x6c   : > { %497 = vmatpush.msra.mxu0 %v444_v30  ;;  %526 = vmatpush.msra.mxu1 %v445_v31 }
  0x6d   : > { %498 = vmatmul.f32.vlgmr.msra.gmra.mxu0 %v440_v32  ;;  %527 = vmatmul.f32.vlgmr.msra.gmra.mxu1 %v440_v32 }
  0x6e   : > { %965 = vmatpush.msra.mxu3 %v915_v8  ;;  %937 = vmatpush.msra.mxu2 %v898_v15 }
  0x70   : > { %966 = vmatpush.msra.mxu3 %v914_v16  ;;  %938 = vmatpush.msra.mxu2 %v897_v21 }
  0x72   : > { %967 = vmatpush.msra.mxu3 %v913_v22  ;;  %939 = vmatpush.msra.mxu2 %v896_v28 }
  0x74   : > { %968 = vmatpush.msra.mxu3 %v912_v29  ;;  %940 = vmatpush.msra.mxu2 %v895_v37 }
  0x75   : > { %501 = vmatmul.f32.gmra.mxu0 %v441_v33  ;;  %530 = vmatmul.f32.gmra.mxu1 %v441_v33 }
  0x76   : > { %969 = vmatpush.msra.mxu3 %v911_v38  ;;  %941 = vmatpush.msra.mxu2 %v894_v47 }
  0x78   : > { %970 = vmatpush.msra.mxu3 %v910_v48 }
  0x7d   : > { %504 = vmatmul.f32.gmra.mxu0 %v442_v34  ;;  %533 = vmatmul.f32.gmra.mxu1 %v442_v34 }
  0x85   : > { %507 = vmatmul.f32.gmra.mxu0 %v443_v35  ;;  %536 = vmatmul.f32.gmra.mxu1 %v443_v35 }
  0xea   : > { %v499_v45 = vpop.f32.mrf.mxu0  ;;  %v528_v46 = vpop.f32.mrf.mxu1 }
  0xeb   : > { %v1754_v49 = vadd.f32 %v499_v45, %v1745_v41  ;;  %v1757_v50 = vadd.f32 %v528_v46, %v1747_v42 }
  0xed   : > { %v1762_v53 = vmul.f32 0.70710677, %v1754_v49  ;;  %v1765_v54 = vmul.f32 0.70710677, %v1757_v50 }
  0xef   : > { %v556_v57 = vmul.f32 %v1762_v53, %v1762_v53  ;;  %v596_v58 = vmul.f32 %v1765_v54, %v1765_v54 }
  0xf1   : > { %v1775_v61 = vmin.f32 %v556_v57, 16.0  ;;  %v1777_v62 = vmin.f32 %v596_v58, 16.0  ;;  %v893_v57 = vld [vmem:[%s1690_s11 + $0x8] sm:$0xff] }
  0xf2   : > { %v502_v63 = vpop.f32.mrf.mxu0  ;;  %v531_v0 = vpop.f32.mrf.mxu1  ;;  %v909_v58 = vld [vmem:[%s1690_s11 + $0x88] sm:$0xff]  ;;  %942 = vmatpush.msra.mxu2 %v893_v57 }
  0xf3   : > { %v558_v3 = vmul.f32 2.1237322e-06, %v1775_v61  ;;  %v598_v4 = vmul.f32 2.1237322e-06, %v1777_v62  ;;  %v1784_v5 = vadd.f32 %v502_v63, %v1745_v41  ;;  %v1787_v6 = vadd.f32 %v531_v0, %v1747_v42  ;;  %971 = vmatpush.msra.mxu3 %v909_v58 }
  0xf4   : > { %v569_v9 = vmul.f32 3.8918573e-05, %v1775_v61  ;;  %v609_v12 = vmul.f32 3.8918573e-05, %v1777_v62 }
  0xf5   : > { %v559_v10 = vadd.f32 0.00028619796, %v558_v3  ;;  %v599_v11 = vadd.f32 0.00028619796, %v598_v4  ;;  %v1794_v13 = vmul.f32 0.70710677, %v1784_v5 }
  0xf6   : > { %v1797_v14 = vmul.f32 0.70710677, %v1787_v6  ;;  %v570_v23 = vadd.f32 0.001143296, %v569_v9  ;;  %v610_v30 = vadd.f32 0.001143296, %v609_v12 }
  0xf7   : > { %v560_v17 = vmul.f32 %v559_v10, %v1775_v61  ;;  %v600_v18 = vmul.f32 %v599_v11, %v1777_v62  ;;  %v636_v19 = vmul.f32 %v1794_v13, %v1794_v13  ;;  %v892_v4 = vld [vmem:[%s1690_s11] sm:$0xff] }
  0xf8   : > { %v676_v20 = vmul.f32 %v1797_v14, %v1797_v14  ;;  %v571_v39 = vmul.f32 %v570_v23, %v1775_v61  ;;  %v611_v51 = vmul.f32 %v610_v30, %v1777_v62  ;;  %v908_v9 = vld [vmem:[%s1690_s11 + $0x80] sm:$0xff]  ;;  %943 = vmatpush.msra.mxu2 %v892_v4 }
  0xf9   : > { %v1809_v24 = vmin.f32 %v636_v19, 16.0  ;;  %v561_v31 = vadd.f32 0.0036580483, %v560_v17  ;;  %v601_v32 = vadd.f32 0.0036580483, %v600_v18  ;;  %972 = vmatpush.msra.mxu3 %v908_v9 }
  0xfa   : > { %v1811_v25 = vmin.f32 %v676_v20, 16.0  ;;  %v505_v26 = vpop.f32.mrf.mxu0  ;;  %v534_v27 = vpop.f32.mrf.mxu1  ;;  %v572_v59 = vadd.f32 0.014752088, %v571_v39  ;;  %v612_v10 = vadd.f32 0.014752088, %v611_v51 }
  0xfb   : > { %v1816_v33 = vadd.f32 %v505_v26, %v1745_v41  ;;  %v1819_v34 = vadd.f32 %v534_v27, %v1747_v42  ;;  %v638_v35 = vmul.f32 2.1237322e-06, %v1809_v24  ;;  %v562_v45 = vmul.f32 %v561_v31, %v1775_v61 }
  0xfc   : > { %v678_v36 = vmul.f32 2.1237322e-06, %v1811_v25  ;;  %v602_v52 = vmul.f32 %v601_v32, %v1777_v62  ;;  %v573_v16 = vmul.f32 %v572_v59, %v1775_v61  ;;  %v613_v23 = vmul.f32 %v612_v10, %v1777_v62 }
  0xfd   : > { %v639_v40 = vadd.f32 0.00028619796, %v638_v35  ;;  %v1827_v44 = vmul.f32 0.70710677, %v1816_v33  ;;  %v1831_v46 = vmul.f32 0.70710677, %v1819_v34 }
  0xfe   : > { %v679_v43 = vadd.f32 0.00028619796, %v678_v36  ;;  %v563_v7 = vadd.f32 0.05243302, %v562_v45  ;;  %v603_v11 = vadd.f32 0.05243302, %v602_v52 }
  0xff   : > { %v640_v55 = vmul.f32 %v639_v40, %v1809_v24  ;;  %v716_v56 = vmul.f32 %v1827_v44, %v1827_v44  ;;  %v756_v63 = vmul.f32 %v1831_v46, %v1831_v46  ;;  %v614_v39 = vadd.f32 0.112945676, %v613_v23 }
 0x100   : > { %v680_v60 = vmul.f32 %v679_v43, %v1811_v25  ;;  %v564_v26 = vmul.f32 %v563_v7, %v1775_v61 }
 0x101   : > { %v641_v0 = vadd.f32 0.0036580483, %v640_v55  ;;  %v1845_v1 = vmin.f32 %v716_v56, 16.0  ;;  %v1848_v8 = vmin.f32 %v756_v63, 16.0  ;;  %v615_v52 = vmul.f32 %v614_v39, %v1777_v62 }
 0x102   : > { %v508_v2 = vpop.f32.mrf.mxu0  ;;  %v537_v3 = vpop.f32.mrf.mxu1  ;;  %v681_v18 = vadd.f32 0.0036580483, %v680_v60  ;;  %v565_v40 = vadd.f32 0.18741608, %v564_v26 }
 0x103   : > { %v718_v12 = vmul.f32 2.1237322e-06, %v1845_v1  ;;  %v1853_v15 = vadd.f32 %v508_v2, %v1745_v41  ;;  %v642_v17 = vmul.f32 %v641_v0, %v1809_v24  ;;  %v758_v19 = vmul.f32 2.1237322e-06, %v1848_v8 }
 0x104   : > { %v1859_v20 = vadd.f32 %v537_v3, %v1747_v42  ;;  %v604_v41 = vmul.f32 %v603_v11, %v1777_v62  ;;  %v682_v30 = vmul.f32 %v681_v18, %v1811_v25  ;;  %v574_v42 = vadd.f32 0.112945676, %v573_v16 }
 0x105   : > { %v719_v21 = vadd.f32 0.00028619796, %v718_v12  ;;  %v759_v22 = vadd.f32 0.00028619796, %v758_v19  ;;  %v1866_v28 = vmul.f32 0.70710677, %v1853_v15  ;;  %v566_v60 = vmul.f32 %v565_v40, %v1775_v61 }
 0x106   : > { %v643_v29 = vadd.f32 0.05243302, %v642_v17  ;;  %v1870_v31 = vmul.f32 0.70710677, %v1859_v20  ;;  %v575_v38 = vmul.f32 %v574_v42, %v1775_v61  ;;  %v605_v43 = vadd.f32 0.18741608, %v604_v41 }
 0x107   : > { %v720_v27 = vmul.f32 %v719_v21, %v1845_v1  ;;  %v760_v35 = vmul.f32 %v759_v22, %v1848_v8  ;;  %v796_v36 = vmul.f32 %v1866_v28, %v1866_v28  ;;  %v683_v48 = vadd.f32 0.05243302, %v682_v30 }
 0x108   : > { %v836_v37 = vmul.f32 %v1870_v31, %v1870_v31  ;;  %v644_v47 = vmul.f32 %v643_v29, %v1809_v24  ;;  %v576_v51 = vadd.f32 0.4994258, %v575_v38  ;;  %v606_v63 = vmul.f32 %v605_v43, %v1777_v62 }
 0x109   : > { %v721_v32 = vadd.f32 0.0036580483, %v720_v27  ;;  %v1878_v45 = vmin.f32 %v796_v36, 16.0  ;;  %v761_v56 = vadd.f32 0.0036580483, %v760_v35  ;;  %v684_v3 = vmul.f32 %v683_v48, %v1811_v25 }
 0x10a   : > { %v1884_v58 = vmin.f32 %v836_v37, 16.0  ;;  %v577_v59 = vmul.f32 %v576_v51, %v1775_v61  ;;  %v616_v0 = vadd.f32 0.4994258, %v615_v52  ;;  %v645_v2 = vadd.f32 0.18741608, %v644_v47 }
 0x10b   : > { %v722_v55 = vmul.f32 %v721_v32, %v1845_v1  ;;  %v798_v57 = vmul.f32 2.1237322e-06, %v1878_v45  ;;  %v762_v9 = vmul.f32 %v761_v56, %v1848_v8  ;;  %v649_v11 = vmul.f32 3.8918573e-05, %v1809_v24 }
 0x10c   : > { %v578_v4 = vadd.f32 1.0, %v577_v59  ;;  %v617_v10 = vmul.f32 %v616_v0, %v1777_v62  ;;  %v838_v16 = vmul.f32 2.1237322e-06, %v1884_v58  ;;  %v567_v17 = vadd.f32 1.1283791, %v566_v60 }
 0x10d   : > { %v723_v7 = vadd.f32 0.05243302, %v722_v55  ;;  %v799_v12 = vadd.f32 0.00028619796, %v798_v57  ;;  %v607_v61 = vadd.f32 1.1283791, %v606_v63  ;;  %v646_v18 = vmul.f32 %v645_v2, %v1809_v24 }
 0x10e   : > { %1337 = vrcp.f32 %v578_v4  ;;  %v685_v19 = vadd.f32 0.18741608, %v684_v3  ;;  %v1895_v21 = vadd.f32 1.0, %v617_v10  ;;  %v763_v23 = vadd.f32 0.05243302, %v762_v9 }
 0x10f   : > { %v724_v22 = vmul.f32 %v723_v7, %v1845_v1  ;;  %v650_v26 = vadd.f32 0.001143296, %v649_v11  ;;  %v800_v41 = vmul.f32 %v799_v12, %v1878_v45  ;;  %v839_v62 = vadd.f32 0.00028619796, %v838_v16 }
 0x110   : > { %1339 = vrcp.f32 %v1895_v21  ;;  %v689_v27 = vmul.f32 3.8918573e-05, %v1811_v25  ;;  %v1902_v29 = vmul.f32 0.5, %v1754_v49  ;;  %v568_v30 = vmul.f32 %v567_v17, %v1762_v53 }
 0x111   : > { %v1906_v42 = vmul.f32 0.5, %v1757_v50  ;;  %v1909_v32 = vmul.f32 %v607_v61, %v1765_v54  ;;  %v1911_v36 = vadd.f32 1.1283791, %v646_v18  ;;  %v1914_v37 = vmul.f32 %v685_v19, %v1811_v25 }
 0x112   : > { %v588_v38 = vand.u32 2147483647, %v578_v4  ;;  %v651_v39 = vmul.f32 %v650_v26, %v1809_v24  ;;  %v1917_v40 = vadd.f32 0.18741608, %v724_v22  ;;  %v1920_v49 = vmul.f32 %v763_v23, %v1848_v8 }
 0x113   : > { %v590_v50 = vand.u32 2147483648, %v578_v4  ;;  %v801_v43 = vadd.f32 0.0036580483, %v800_v41  ;;  %v1923_v54 = vmul.f32 %v839_v62, %v1884_v58  ;;  %v690_v48 = vadd.f32 0.001143296, %v689_v27 }
 0x114   : > { %v1338_v35 = vpop.eup %1337  ;;  %v652_v47 = vadd.f32 0.014752088, %v651_v39  ;;  %vm584_vm0 = vweird.f32 %v578_v4  ;;  %v729_v52 = vmul.f32 3.8918573e-05, %v1845_v1  ;;  %v769_v55 = vmul.f32 3.8918573e-05, %v1848_v8 }
 0x115   : > { %v580_v53 = vmul.f32 %v1338_v35, %v578_v4  ;;  %vm1927_vm1 = vcmp.eq.f32.partialorder %v588_v38, 8.507059e+37  ;;  %v628_v59 = vand.u32 2147483647, %v1895_v21  ;;  %v691_v63 = vmul.f32 %v690_v48, %v1811_v25 }
 0x116   : > { %v1340_v56 = vpop.eup %1339  ;;  %v653_v60 = vmul.f32 %v652_v47, %v1809_v24  ;;  %vm585_vm2 = vweird.f32 %v1338_v35  ;;  %v730_v3 = vadd.f32 0.001143296, %v729_v52  ;;  %v591_v7 = vor.u32 1.1754944e-38, %v590_v50 }
 0x117   : > { %v581_v51 = vsub.f32 1.0, %v580_v53  ;;  %v620_v2 = vmul.f32 %v1340_v56, %v1895_v21  ;;  %v630_v9 = vand.u32 2147483648, %v1895_v21  ;;  %v692_v11 = vadd.f32 0.014752088, %v691_v63  ;;  %vm586_vm3 = vmor %vm584_vm0, %vm585_vm2 }
 0x118   : > { %v654_v10 = vadd.f32 0.112945676, %v653_v60  ;;  %v731_v17 = vmul.f32 %v730_v3, %v1845_v1  ;;  %v770_v61 = vadd.f32 0.001143296, %v769_v55  ;;  %vm624_vm4 = vweird.f32 %v1895_v21 }
 0x119   : > { %v582_v0 = vmul.f32 %v1338_v35, %v581_v51  ;;  %v621_v16 = vsub.f32 1.0, %v620_v2  ;;  %vm625_vm5 = vweird.f32 %v1340_v56  ;;  %v693_v19 = vmul.f32 %v692_v11, %v1811_v25 }
 0x11a   : > { %v655_v18 = vmul.f32 %v654_v10, %v1809_v24  ;;  %v732_v26 = vadd.f32 0.014752088, %v731_v17  ;;  %v771_v41 = vmul.f32 %v770_v61, %v1848_v8  ;;  %vm1944_vm6 = vcmp.eq.f32.partialorder %v628_v59, 8.507059e+37  ;;  %vm626_vm7 = vmor %vm624_vm4, %vm625_vm5 }
 0x11b   : > { %v583_v12 = vadd.f32 %v1338_v35, %v582_v0  ;;  %v622_v23 = vmul.f32 %v1340_v56, %v621_v16  ;;  %v631_v4 = vor.u32 1.1754944e-38, %v630_v9  ;;  %v694_v50 = vadd.f32 0.112945676, %v693_v19 }
 0x11c   : > { %v656_v38 = vadd.f32 0.4994258, %v655_v18  ;;  %v733_v47 = vmul.f32 %v732_v26, %v1845_v1  ;;  %v772_v48 = vadd.f32 0.014752088, %v771_v41  ;;  %v809_v51 = vmul.f32 3.8918573e-05, %v1878_v45 }
 0x11d   : > { %v587_v22 = vsel %vm586_vm3, %v1338_v35, %v583_v12  ;;  %v623_v53 = vadd.f32 %v1340_v56, %v622_v23  ;;  %v849_v52 = vmul.f32 3.8918573e-05, %v1884_v58  ;;  %v695_v59 = vmul.f32 %v694_v50, %v1811_v25 }
 0x11e   : > { %v592_v62 = vsel %vm1927_vm1, %v591_v7, %v587_v22  ;;  %v657_v35 = vmul.f32 %v656_v38, %v1809_v24  ;;  %v773_v21 = vmul.f32 %v772_v48, %v1848_v8  ;;  %v810_v0 = vadd.f32 0.001143296, %v809_v51 }
 0x11f   : > { %v593_v39 = vmul.f32 %v592_v62, %v568_v30  ;;  %v627_v57 = vsel %vm626_vm7, %v1340_v56, %v623_v53  ;;  %v734_v30 = vadd.f32 0.112945676, %v733_v47  ;;  %v696_v3 = vadd.f32 0.4994258, %v695_v59 }
 0x120   : > { %v632_v60 = vsel %vm1944_vm6, %v631_v4, %v627_v57  ;;  %v1958_v63 = vadd.f32 1.0, %v657_v35  ;;  %v726_v56 = vmul.f32 %v1917_v40, %v1845_v1  ;;  %v765_v9 = vadd.f32 0.18741608, %v1920_v49 }
 0x121   : > { %v1226_v55 = vclamps-f32 %v593_v39, 1.0  ;;  %v633_v24 = vmul.f32 %v632_v60, %v1909_v32  ;;  %v735_v7 = vmul.f32 %v734_v30, %v1845_v1  ;;  %v802_v10 = vmul.f32 %v801_v43, %v1878_v45 }
 0x122   : > { %1341 = vrcp.f32 %v1958_v63  ;;  %v697_v16 = vmul.f32 %v696_v3, %v1811_v25  ;;  %v687_v32 = vadd.f32 1.1283791, %v1914_v37  ;;  %v841_v61 = vadd.f32 0.0036580483, %v1923_v54 }
 0x123   : > { %v876_v2 = vadd.f32 1.0, %v1226_v55  ;;  %v1227_v12 = vclamps-f32 %v633_v24, 1.0  ;;  %v736_v17 = vadd.f32 0.4994258, %v735_v7  ;;  %v774_v18 = vadd.f32 0.112945676, %v773_v21 }
 0x124   : > { %v811_v19 = vmul.f32 %v810_v0, %v1878_v45  ;;  %v1973_v49 = vadd.f32 1.0, %v697_v16  ;;  %v850_v22 = vadd.f32 0.001143296, %v849_v52  ;;  %v803_v23 = vadd.f32 0.05243302, %v802_v10 }
 0x125   : > { %v884_v11 = vmul.f32 %v876_v2, %v1902_v29  ;;  %v877_v40 = vadd.f32 1.0, %v1227_v12  ;;  %v737_v43 = vmul.f32 %v736_v17, %v1845_v1  ;;  %v766_v29 = vmul.f32 %v765_v9, %v1848_v8 }
 0x126   : > { %v775_v25 = vmul.f32 %v774_v18, %v1848_v8  ;;  %v812_v26 = vadd.f32 0.014752088, %v811_v19  ;;  %v1979_v37 = vmul.f32 0.5, %v1784_v5  ;;  %v727_v54 = vadd.f32 1.1283791, %v726_v56 }
 0x127   : > { %944 = vmatmul.f32.vlgmr.msra.gmra.mxu2 %v884_v11  ;;  %v885_v41 = vmul.f32 %v877_v40, %v1906_v42  ;;  %1343 = vrcp.f32 %v1973_v49  ;;  %v842_v27 = vmul.f32 %v841_v61, %v1884_v58  ;;  %v1984_v4 = vadd.f32 1.0, %v737_v43 }
 0x128   : > { %v1342_v62 = vpop.eup %1341  ;;  %v776_v1 = vadd.f32 0.4994258, %v775_v25  ;;  %v813_v38 = vmul.f32 %v812_v26, %v1878_v45  ;;  %v648_v39 = vmul.f32 %v1911_v36, %v1794_v13  ;;  %v1990_v53 = vmul.f32 %v687_v32, %v1797_v14 }
 0x129   : > { %973 = vmatmul.f32.vlgmr.msra.gmra.mxu3 %v885_v41  ;;  %v660_v5 = vmul.f32 %v1342_v62, %v1958_v63  ;;  %v851_v42 = vmul.f32 %v850_v22, %v1884_v58  ;;  %v1994_v50 = vadd.f32 1.1283791, %v766_v29  ;;  %v804_v47 = vmul.f32 %v803_v23, %v1878_v45 }
 0x12a   : > { %v668_v35 = vand.u32 2147483647, %v1958_v63  ;;  %1345 = vrcp.f32 %v1984_v4  ;;  %v670_v51 = vand.u32 2147483648, %v1958_v63  ;;  %v777_v13 = vmul.f32 %v776_v1, %v1848_v8 }
 0x12b   : > { %v661_v48 = vsub.f32 1.0, %v660_v5  ;;  %v814_v14 = vadd.f32 0.112945676, %v813_v38  ;;  %v2002_v36 = vmul.f32 %v727_v54, %v1827_v44  ;;  %v2004_v52 = vadd.f32 0.05243302, %v842_v27 }
 0x12c   : > { %v708_v55 = vand.u32 2147483647, %v1973_v49  ;;  %v852_v57 = vadd.f32 0.014752088, %v851_v42  ;;  %vm665_vm8 = vweird.f32 %v1342_v62  ;;  %v2007_v60 = vadd.f32 1.0, %v777_v13 }
 0x12d   : > { %v1344_v59 = vpop.eup %1343  ;;  %v662_v30 = vmul.f32 %v1342_v62, %v661_v48  ;;  %v815_v21 = vmul.f32 %v814_v14, %v1878_v45  ;;  %v2010_v0 = vadd.f32 0.18741608, %v804_v47  ;;  %vm664_vm9 = vweird.f32 %v1958_v63 }
 0x12e   : > { %v700_v8 = vmul.f32 %v1344_v59, %v1973_v49  ;;  %v853_v44 = vmul.f32 %v852_v57, %v1884_v58  ;;  %vm669_vm10 = vcmp.eq.f32.partialorder %v668_v35, 8.507059e+37  ;;  %v671_v24 = vor.u32 1.1754944e-38, %v670_v51  ;;  %vm666_vm11 = vmor %vm664_vm9, %vm665_vm8 }
 0x12f   : > { %v663_v2 = vadd.f32 %v1342_v62, %v662_v30  ;;  %1347 = vrcp.f32 %v2007_v60  ;;  %v710_v56 = vand.u32 2147483648, %v1973_v49  ;;  %v816_v9 = vadd.f32 0.4994258, %v815_v21 }
 0x130   : > { %v1346_v3 = vpop.eup %1345  ;;  %v701_v7 = vsub.f32 1.0, %v700_v8  ;;  %v854_v10 = vadd.f32 0.112945676, %v853_v44  ;;  %vm704_vm12 = vweird.f32 %v1973_v49  ;;  %vm2018_vm13 = vcmp.eq.f32.partialorder %v708_v55, 8.507059e+37 }
 0x131   : > { %v667_v11 = vsel %vm666_vm11, %v1342_v62, %v663_v2  ;;  %v740_v12 = vmul.f32 %v1346_v3, %v1984_v4  ;;  %vm705_vm14 = vweird.f32 %v1344_v59  ;;  %v817_v32 = vmul.f32 %v816_v9, %v1878_v45 }
 0x132   : > { %v672_v16 = vsel %vm669_vm10, %v671_v24, %v667_v11  ;;  %v702_v17 = vmul.f32 %v1344_v59, %v701_v7  ;;  %v748_v19 = vand.u32 2147483647, %v1984_v4  ;;  %v855_v40 = vmul.f32 %v854_v10, %v1884_v58  ;;  %vm706_vm15 = vmor %vm704_vm12, %vm705_vm14 }
 0x133   : > { %v673_v61 = vmul.f32 %v672_v16, %v648_v39  ;;  %v741_v18 = vsub.f32 1.0, %v740_v12  ;;  %v711_v22 = vor.u32 1.1754944e-38, %v710_v56  ;;  %v750_v29 = vand.u32 2147483648, %v1984_v4 }
 0x134   : > { %v703_v43 = vadd.f32 %v1344_v59, %v702_v17  ;;  %v2027_v23 = vadd.f32 1.0, %v817_v32  ;;  %vm745_vm0 = vweird.f32 %v1346_v3  ;;  %v856_v41 = vadd.f32 0.4994258, %v855_v40 }
 0x135   : > { %v1348_v25 = vpop.eup %1347  ;;  %v1228_v26 = vclamps-f32 %v673_v61, 1.0  ;;  %v742_v54 = vmul.f32 %v1346_v3, %v741_v18  ;;  %vm744_vm1 = vweird.f32 %v1984_v4  ;;  %vm749_vm2 = vcmp.eq.f32.partialorder %v748_v19, 8.507059e+37 }
 0x136   : > { %v707_v62 = vsel %vm706_vm15, %v1344_v59, %v703_v43  ;;  %v780_v27 = vmul.f32 %v1348_v25, %v2007_v60  ;;  %1349 = vrcp.f32 %v2027_v23  ;;  %vm746_vm3 = vmor %vm744_vm1, %vm745_vm0  ;;  %v751_v49 = vor.u32 1.1754944e-38, %v750_v29 }
 0x137   : > { %v878_v1 = vadd.f32 1.0, %v1228_v26  ;;  %v712_v38 = vsel %vm2018_vm13, %v711_v22, %v707_v62  ;;  %v743_v39 = vadd.f32 %v1346_v3, %v742_v54  ;;  %v788_v47 = vand.u32 2147483647, %v2007_v60 }
 0x138   : > { %v713_v5 = vmul.f32 %v712_v38, %v1990_v53  ;;  %v781_v42 = vsub.f32 1.0, %v780_v27  ;;  %v790_v48 = vand.u32 2147483648, %v2007_v60  ;;  %v857_v51 = vmul.f32 %v856_v41, %v1884_v58 }
 0x139   : > { %v886_v35 = vmul.f32 %v878_v1, %v1979_v37  ;;  %v747_v4 = vsel %vm746_vm3, %v1346_v3, %v743_v39  ;;  %vm785_vm4 = vweird.f32 %v1348_v25  ;;  %v543_v57 = vmul.f32 0.5, %v1787_v6 }
 0x13a   : > { %v1229_v13 = vclamps-f32 %v713_v5, 1.0  ;;  %v752_v14 = vsel %vm749_vm2, %v751_v49, %v747_v4  ;;  %v782_v55 = vmul.f32 %v1348_v25, %v781_v42  ;;  %v844_v53 = vmul.f32 %v2004_v52, %v1884_v58 }
 0x13b   : > { %947 = vmatmul.f32.gmra.mxu2 %v886_v35  ;;  %v753_v59 = vmul.f32 %v752_v14, %v2002_v36  ;;  %v858_v30 = vadd.f32 1.0, %v857_v51  ;;  %v806_v37 = vmul.f32 %v2010_v0, %v1878_v45  ;;  %vm784_vm5 = vweird.f32 %v2007_v60 }
 0x13c   : > { %v1350_v21 = vpop.eup %1349  ;;  %v879_v8 = vadd.f32 1.0, %v1229_v13  ;;  %v783_v44 = vadd.f32 %v1348_v25, %v782_v55  ;;  %vm786_vm6 = vmor %vm784_vm5, %vm785_vm4  ;;  %v791_v24 = vor.u32 1.1754944e-38, %v790_v48  ;;  %v768_v52 = vmul.f32 %v1994_v50, %v1831_v46 }
 0x13d   : > { %v1230_v2 = vclamps-f32 %v753_v59, 1.0  ;;  %v820_v6 = vmul.f32 %v1350_v21, %v2027_v23  ;;  %1351 = vrcp.f32 %v858_v30  ;;  %vm789_vm7 = vcmp.eq.f32.partialorder %v788_v47, 8.507059e+37 }
 0x13e   : > { %v887_v3 = vmul.f32 %v879_v8, %v543_v57  ;;  %v787_v36 = vsel %vm786_vm6, %v1348_v25, %v783_v44  ;;  %v544_v7 = vmul.f32 0.5, %v1816_v33  ;;  %v807_v9 = vadd.f32 1.1283791, %v806_v37 }
 0x13f   : > { %v880_v56 = vadd.f32 1.0, %v1230_v2  ;;  %v792_v45 = vsel %vm789_vm7, %v791_v24, %v787_v36  ;;  %v821_v0 = vsub.f32 1.0, %v820_v6  ;;  %v845_v10 = vadd.f32 0.18741608, %v844_v53 }
 0x140   : > { %976 = vmatmul.f32.gmra.mxu3 %v887_v3  ;;  %v793_v60 = vmul.f32 %v792_v45, %v768_v52  ;;  %v830_v11 = vand.u32 2147483648, %v2027_v23  ;;  %vm825_vm8 = vweird.f32 %v1350_v21  ;;  %v828_v16 = vand.u32 2147483647, %v2027_v23 }
 0x141   : > { %v888_v63 = vmul.f32 %v880_v56, %v544_v7  ;;  %v822_v12 = vmul.f32 %v1350_v21, %v821_v0  ;;  %v545_v17 = vmul.f32 0.5, %v1819_v34  ;;  %vm824_vm9 = vweird.f32 %v2027_v23 }
 0x142   : > { %v1231_v46 = vclamps-f32 %v793_v60, 1.0  ;;  %v846_v32 = vmul.f32 %v845_v10, %v1884_v58  ;;  %vm826_vm10 = vmor %vm824_vm9, %vm825_vm8  ;;  %v831_v18 = vor.u32 1.1754944e-38, %v830_v11  ;;  %v808_v40 = vmul.f32 %v807_v9, %v1866_v28 }
 0x143   : > { %v1352_v50 = vpop.eup %1351  ;;  %950 = vmatmul.f32.gmra.mxu2 %v888_v63  ;;  %v823_v33 = vadd.f32 %v1350_v21, %v822_v12  ;;  %vm829_vm11 = vcmp.eq.f32.partialorder %v828_v16, 8.507059e+37  ;;  %v870_v54 = vand.u32 2147483648, %v858_v30  ;;  %v868_v23 = vand.u32 2147483647, %v858_v30 }
 0x144   : > { %v881_v61 = vadd.f32 1.0, %v1231_v46  ;;  %v860_v19 = vmul.f32 %v1352_v50, %v858_v30  ;;  %v847_v34 = vadd.f32 1.1283791, %v846_v32  ;;  %vm865_vm12 = vweird.f32 %v1352_v50 }
 0x145   : > { %v827_v43 = vsel %vm826_vm10, %v1350_v21, %v823_v33  ;;  %vm864_vm13 = vweird.f32 %v858_v30  ;;  %v546_v27 = vmul.f32 0.5, %v1853_v15  ;;  %v871_v28 = vor.u32 1.1754944e-38, %v870_v54  ;;  %v1336_v15 = vld [vmem:[%s437_s26] ss:$0 sm:$0xff] }
 0x146   : > { %v889_v22 = vmul.f32 %v881_v61, %v545_v17  ;;  %v832_v29 = vsel %vm829_vm11, %v831_v18, %v827_v43  ;;  %v861_v25 = vsub.f32 1.0, %v860_v19  ;;  %vm866_vm14 = vmor %vm864_vm13, %vm865_vm12  ;;  %v848_v38 = vmul.f32 %v847_v34, %v1870_v31 }
 0x147   : > { %v833_v26 = vmul.f32 %v832_v29, %v808_v40  ;;  %vm869_vm15 = vcmp.eq.f32.partialorder %v868_v23, 8.507059e+37  ;;  %v547_v35 = vmul.f32 0.5, %v1859_v20 }
 0x148   : > { %979 = vmatmul.f32.gmra.mxu3 %v889_v22  ;;  %v862_v41 = vmul.f32 %v1352_v50, %v861_v25 }
 0x149   : > { %v1232_v62 = vclamps-f32 %v833_v26, 1.0 }
 0x14a   : > { %v863_v58 = vadd.f32 %v1352_v50, %v862_v41 }
 0x14b   : > { %v882_v1 = vadd.f32 1.0, %v1232_v62 }
 0x14c   : > { %v867_v39 = vsel %vm866_vm14, %v1352_v50, %v863_v58 }
 0x14d   : > { %v890_v5 = vmul.f32 %v882_v1, %v546_v27  ;;  %v872_v49 = vsel %vm869_vm15, %v871_v28, %v867_v39 }
 0x14e   : > { %v873_v42 = vmul.f32 %v872_v49, %v848_v38 }
 0x14f   : > { %953 = vmatmul.f32.gmra.mxu2 %v890_v5 }
 0x150   : > { %v1233_v47 = vclamps-f32 %v873_v42, 1.0 }
 0x152   : > { %v883_v4 = vadd.f32 1.0, %v1233_v47 }
 0x154   : > { %v891_v48 = vmul.f32 %v883_v4, %v547_v35 }
 0x156   : > { %982 = vmatmul.f32.gmra.mxu3 %v891_v48 }
 0x1aa   : > { %v945_v51 = vpop.f32.mrf.mxu2 }
 0x1ab   : > { %v946_v31 = vadd.f32 %v1336_v15, %v945_v51 }
 0x1ac   : > { %v974_v13 = vpop.f32.mrf.mxu3 }
 0x1ad   : > { %v975_v14 = vadd.f32 %v974_v13, %v946_v31 }
 0x1af   : > { %986 = vst [vmem:[%s432_s25] sm:$0xff] %v975_v14 }
 0x1be   : > { %v948_v55 = vpop.f32.mrf.mxu2 }
 0x1bf   : > { %v949_v57 = vadd.f32 %v1336_v15, %v948_v55 }
 0x1c3   : > { %v977_v53 = vpop.f32.mrf.mxu3 }
 0x1c4   : > { %v978_v20 = vadd.f32 %v977_v53, %v949_v57 }
 0x1c6   : > { %987 = vst [vmem:[%s432_s25 + $0x8] sm:$0xff] %v978_v20  ;;  %v951_v59 = vpop.f32.mrf.mxu2 }
 0x1c7   : > { %v952_v30 = vadd.f32 %v1336_v15, %v951_v59 }
 0x1cb   : > { %v980_v21 = vpop.f32.mrf.mxu3 }
 0x1cc   : > { %v981_v37 = vadd.f32 %v980_v21, %v952_v30 }
 0x1ce   : > { %988 = vst [vmem:[%s432_s25 + $0x10] sm:$0xff] %v981_v37 }
 0x1d2   : > { %v954_v8 = vpop.f32.mrf.mxu2 }
 0x1d3   : > { %v955_v44 = vadd.f32 %v1336_v15, %v954_v8 }
 0x1d9   : > { %v983_v2 = vpop.f32.mrf.mxu3 }
 0x1da   : > { %v984_v24 = vadd.f32 %v983_v2, %v955_v44 }
 0x1dc   : > { %989 = vst [vmem:[%s432_s25 + $0x18] sm:$0xff] %v984_v24 }
 0x1dd   : > { %s1242_s20 = sshll.u32 %s1491_s21, 4  ;;  %s1018_s8 = sshll.u32 %s432_s25, 4  ;;  %s1019_s8 = int_to_ptr.vmem [resolvable:$true] %s1018_s8 }
 0x1de   : > { %s1007_s29 = scalar_lea.hbm %s2115_s5, %s1242_s20  ;;  %s1511_s12 = smov 256  }
 0x1df   : > { %s1020_s28 = sshll.u32 %s1007_s29, 4  ;;  %1258 = sst [smem:[#allocation14]] (%p1603_p9), %s1511_s12  ;;  %s1021_s28 = int_to_ptr.hbm [resolvable:$true] %s1020_s28 }
 0x1e0   : > { %s1512_s18 = smov 512   ;;  %s1513_s16 = smov 2  }
 0x1e1   : > { %1259 = sst [smem:[#allocation14 + $0x1]] (%p1603_p9), %s1512_s18  ;;  %s1514_s21 = smov 128  }
 0x1e2   : > { %1260 = sst [smem:[#allocation14 + $0x2]] (%p1603_p9), %s1513_s16  ;;  %s1515_s15 = smov 8  }
 0x1e3   : > { %1261 = sst [smem:[#allocation14 + $0x3]] (%p1603_p9), %s1514_s21  ;;  %s1516_s17 = smov [#allocation13]  }
 0x1e4   : > { %1262 = sst [smem:[#allocation14 + $0x4]] (%p1603_p9), %s1514_s21  ;;  %s1517_s27 = smov 0  }
 0x1e5   : > { %1263 = sst [smem:[#allocation14 + $0x5]] (%p1603_p9), %s1515_s15 }
 0x1e6   : > { %1264 = dma.general (%p1603_p9), %s1019_s8, 512, %s1021_s28, %s991_s13, %s1516_s17, [#allocation14], %s1517_s27, 0  }
 0x1e7 PF: > { %s2139_s10 = sld [smem:[#allocation20_spill]]  ;;  %p1267_p3 = pnand %p1206_p12, %p1610_p11 }
 0x1e9   : > { %p1268_p4 = pneg %p1267_p3 }
 0x1ed   : > { %s1048_s24 = sand.u32 1, %s2139_s10  }
 0x1ee   : > { %s1049_s30 = scalar_lea.sflag [#allocation4], %s1048_s24 }
 0x1ef   : > { %1474 = dma.done.wait (%p1268_p4), %s1049_s30, 512  }
 0x1f0   : > { %1476 = vsyncadd (%p1268_p4), %s1049_s30, 4294966784  ;;  %s27_s23 = sadd.s32 1, %s1499_s23   ;;  %s2141_s7 = sld [smem:[#allocation21_spill]] }
 0x1f1   : > { %p24_p5 = scmp.ge.s32.totalorder %s27_s23, 4   ;;  %s2142_s20 = sld [smem:[#allocation23_spill]] }
 0x1f2   : > { %s2143_s6 = sld [smem:[#allocation22_spill]]  ;;  %s2144_s18 = smov %s1483_s19 }
 0x1f3   : > { %s2146_s21 = smov %s1495_s22 }
 0x1f4   :  { %26 = sbr.rel (!%p24_p5) target bundleno = 13 (0xd), region = 135 }
 0x1f6   : > { %s2145_s19 = smov %s2141_s7 }
 0x1f8   : > { %s2147_s22 = smov %s2143_s6 }
 0x1f9   :  { %1055 = vsyncpa [#allocation3], 1 }
 0x1fa   :  { %1057 = vsyncpa [#allocation3 + $0x1], 1 }
 0x1fb   :  { %1058 = vsyncpa [#allocation6], 1 }
 0x1fc   :  { %1060 = vsyncpa [#allocation6 + $0x1], 1 }
 0x1fd   :  { %1061 = vsyncpa [#allocation9], 1 }
 0x1fe   :  { %1063 = vsyncpa [#allocation9 + $0x1], 1 }
 0x1ff   :  { %1064 = vsyncpa [#allocation4], 1 }
 0x200   :  { %1066 = vsyncpa [#allocation4 + $0x1], 1 }

</bundles_post_ra>
